<compile_context>
chip_gen: v5e
topology: v5e:2x2
jax: 0.10.0
libtpu: 0.0.40
codegen_flags: <defaults>
</compile_context>

<pallas_src>
import jax
import jax.numpy as jnp
from jax.experimental import pallas as pl
from jax.experimental.pallas import tpu as pltpu

EPS = 1e-5

# ----- parameter-slab layout (rows x 128 lanes, f32) ------------------------
# W1 [64,16] : rows   0: 64, cols  0:16
# W2 [32,64] : rows  64: 96, cols  0:64
# W3 [32,32] : rows  96:128, cols  0:32
# W4 [ 5,32] : rows 128:133, cols  0:32
# g1/be1 [64]: rows   0: 64, cols 64 / 65
# g2/be2 [32]: rows   0: 32, cols 66 / 67
# g3/be3 [32]: rows   0: 32, cols 68 / 69
# g4/be4 [ 5]: rows   0:  5, cols 70 / 71
SLAB_SHAPE = (136, 128)


def _three_layer_bn_kernel(x_ref, p_ref, o_ref):
    batch = x_ref.shape[0]
    inv_b = jnp.float32(1.0 / batch)

    def bn(y, gamma, beta):
        # Training-mode BatchNorm over the batch (lane) axis, single-pass
        # biased variance.  y: [F, B], gamma/beta: [F, 1].
        # (E[y^2]-E[y]^2 cancellation is acceptable for standardized
        #  jet-tagging features at f32.)
        s = jnp.sum(y, axis=1, keepdims=True)
        ss = jnp.sum(y * y, axis=1, keepdims=True)
        mean = s * inv_b
        var = jnp.maximum(ss * inv_b - mean * mean, 0.0)
        scale = jax.lax.rsqrt(var + jnp.float32(EPS)) * gamma      # [F, 1]
        return (y - mean) * scale + beta

    x = x_ref[...]                                                 # [B, 16]

    # Layer 1: 16 -> 64.  Contract dim 1 of W1 [64,16] with dim 1 of x [B,16]
    # -> [64, B] (feature-on-sublane / batch-on-lane), no explicit transpose.
    h = jax.lax.dot_general(
        p_ref[0:64, 0:16], x,
        dimension_numbers=(((1,), (1,)), ((), ())),
        preferred_element_type=jnp.float32)
    h = jnp.maximum(bn(h, p_ref[0:64, 64:65], p_ref[0:64, 65:66]), 0.0)

    # Layer 2: 64 -> 32
    h = jnp.dot(p_ref[64:96, 0:64], h, preferred_element_type=jnp.float32)
    h = jnp.maximum(bn(h, p_ref[0:32, 66:67], p_ref[0:32, 67:68]), 0.0)

    # Layer 3: 32 -> 32
    h = jnp.dot(p_ref[96:128, 0:32], h, preferred_element_type=jnp.float32)
    h = jnp.maximum(bn(h, p_ref[0:32, 68:69], p_ref[0:32, 69:70]), 0.0)

    # Layer 4: 32 -> 5, BN, softmax over the class (sublane) axis.
    h = jnp.dot(p_ref[128:133, 0:32], h, preferred_element_type=jnp.float32)
    h = bn(h, p_ref[0:5, 70:71], p_ref[0:5, 71:72])                # [5, B]

    m = jnp.max(h, axis=0, keepdims=True)
    e = jnp.exp(h - m)
    denom = jnp.sum(e, axis=0, keepdims=True)
    o_ref[...] = e * pl.reciprocal(denom, approx=False)


def _vmem_limit_bytes():
    # Generation-aware scoped-VMEM budget (~3/4 of physical):
    #   v5e/v6e (128 MiB) -> 96 MiB, v7x (64 MiB) -> 48 MiB.
    try:
        cap = getattr(pltpu.get_tpu_info(), "vmem_capacity_bytes", None)
    except Exception:
        cap = None
    if cap is None:
        cap = 64 * 1024 * 1024        # conservative: fits every generation
    return int(cap) // 4 * 3


def three_layer_bn_forward(x, param_slab):
    """x: [B, 16] float32; param_slab: [136, 128] float32 (see pack_params)."""
    B = x.shape[0]
    x = x.astype(jnp.float32)

    matmul_flops = 2 * B * (16 * 64 + 64 * 32 + 32 * 32 + 32 * 5)
    elemwise_flops = 10 * B * (64 + 32 + 32 + 5)
    bytes_accessed = (B * 16 + B * 5) * 4 + SLAB_SHAPE[0] * SLAB_SHAPE[1] * 4

    # TODO(synk): for batches beyond the whole-batch VMEM budget (hundreds of
    #   thousands of samples at ~600 B/sample), restructure to a batch-tiled
    #   grid with a two-pass per-layer BN (sum/sumsq accumulators, pl.when
    #   init/finalize on an "arbitrary" axis); that restructure is also what
    #   enables the dual-TensorCore batch split on v7x.
    out_t = pl.pallas_call(
        _three_layer_bn_kernel,
        out_shape=jax.ShapeDtypeStruct((5, B), jnp.float32),
        in_specs=[
            pl.BlockSpec(memory_space=pltpu.MemorySpace.VMEM),
            pl.BlockSpec(memory_space=pltpu.MemorySpace.VMEM),
        ],
        out_specs=pl.BlockSpec(memory_space=pltpu.MemorySpace.VMEM),
        compiler_params=pltpu.CompilerParams(
            vmem_limit_bytes=_vmem_limit_bytes()),
        cost_estimate=pl.CostEstimate(
            flops=matmul_flops + elemwise_flops,
            transcendentals=6 * B + 133,
            bytes_accessed=bytes_accessed),
    )(x, param_slab)

    return out_t.T                               # back to [B, 5]


def init_params(key):
    """PyTorch-style parameters: per layer (W [out,in], b [out], gamma, beta).

    Linear W, b ~ U(-1/sqrt(fan_in), 1/sqrt(fan_in)); BN gamma=1, beta=0.
    The Linear biases are kept here (and in the reference) only to mirror the
    PyTorch module; the kernel omits them since they cancel under train-mode BN.
    """
    dims = [(16, 64), (64, 32), (32, 32), (32, 5)]
    layers = []
    for fan_in, fan_out in dims:
        key, kw, kb = jax.random.split(key, 3)
        bound = 1.0 / (fan_in ** 0.5)
        w = jax.random.uniform(kw, (fan_out, fan_in), jnp.float32,
                               minval=-bound, maxval=bound)
        b = jax.random.uniform(kb, (fan_out,), jnp.float32,
                               minval=-bound, maxval=bound)
        layers.append((w, b,
                       jnp.ones((fan_out,), jnp.float32),
                       jnp.zeros((fan_out,), jnp.float32)))
    return tuple(layers)


def pack_params(params):
    """Pack W1..W4 and BN gamma/beta into one [136, 128] f32 slab."""
    (w1, _, g1, be1), (w2, _, g2, be2), (w3, _, g3, be3), (w4, _, g4, be4) = params
    slab = jnp.zeros(SLAB_SHAPE, jnp.float32)
    slab = slab.at[0:64, 0:16].set(w1)
    slab = slab.at[64:96, 0:64].set(w2)
    slab = slab.at[96:128, 0:32].set(w3)
    slab = slab.at[128:133, 0:32].set(w4)
    slab = slab.at[0:64, 64].set(g1)
    slab = slab.at[0:64, 65].set(be1)
    slab = slab.at[0:32, 66].set(g2)
    slab = slab.at[0:32, 67].set(be2)
    slab = slab.at[0:32, 68].set(g3)
    slab = slab.at[0:32, 69].set(be3)
    slab = slab.at[0:5, 70].set(g4)
    slab = slab.at[0:5, 71].set(be4)
    return slab


def reference_forward(x, params):
    """Pure-JAX reference matching the PyTorch module (with Linear biases)."""
    h = x
    for idx, (w, b, gamma, beta) in enumerate(params):
        h = h @ w.T + b
        mean = jnp.mean(h, axis=0, keepdims=True)
        var = jnp.mean((h - mean) ** 2, axis=0, keepdims=True)
        h = (h - mean) * jax.lax.rsqrt(var + EPS) * gamma + beta
        if idx < 3:
            h = jnp.maximum(h, 0.0)
    return jax.nn.softmax(h, axis=1)


if __name__ == "__main__":
    key = jax.random.PRNGKey(0)
    kx, kp = jax.random.split(key)
    B = 8
    x = jax.random.normal(kx, (B, 16), jnp.float32)
    params = init_params(kp)
    slab = pack_params(params)

    out = jax.block_until_ready(three_layer_bn_forward(x, slab))
    ref = reference_forward(x, params)

    assert out.shape == (B, 5)
    assert jnp.allclose(jnp.sum(out, axis=1), 1.0, atol=1e-5)
    assert jnp.allclose(out, ref, atol=1e-5, rtol=1e-5), "mismatch vs reference"

    print("KERNEL_OK")
</pallas_src>

<mosaic_0001>
module attributes {stable_mosaic.version = 11 : i64} {
  func.func @_three_layer_bn_kernel(%arg0: memref<8x16xf32, #tpu.memory_space<vmem>>, %arg1: memref<136x128xf32, #tpu.memory_space<vmem>>, %arg2: memref<5x8xf32, #tpu.memory_space<vmem>>) attributes {dimension_semantics = [], scalar_prefetch = 0 : i64, scratch_operands = 0 : i64, tpu.core_type = #tpu.core_type<tc>} {
    %c0 = arith.constant 0 : index
    %c0_0 = arith.constant 0 : index
    %0 = vector.load %arg0[%c0, %c0_0] : memref<8x16xf32, #tpu.memory_space<vmem>>, vector<8x16xf32>
    %c0_1 = arith.constant 0 : index
    %c0_2 = arith.constant 0 : index
    %1 = vector.load %arg1[%c0_1, %c0_2] : memref<136x128xf32, #tpu.memory_space<vmem>>, vector<64x16xf32>
    %cst = arith.constant dense<0.000000e+00> : vector<64x8xf32>
    %2 = tpu.matmul %1, %0, %cst {dimension_numbers = #tpu.dot_dimension_numbers<[1], [1], [0], [0], [0, 0, 1, 0], [], []>} : vector<64x16xf32>, vector<8x16xf32>, vector<64x8xf32> -> vector<64x8xf32>
    %c0_3 = arith.constant 0 : index
    %c64 = arith.constant 64 : index
    %3 = vector.load %arg1[%c0_3, %c64] : memref<136x128xf32, #tpu.memory_space<vmem>>, vector<64x1xf32>
    %c0_4 = arith.constant 0 : index
    %c65 = arith.constant 65 : index
    %4 = vector.load %arg1[%c0_4, %c65] : memref<136x128xf32, #tpu.memory_space<vmem>>, vector<64x1xf32>
    %cst_5 = arith.constant dense<0.000000e+00> : vector<64xf32>
    %5 = vector.multi_reduction <add>, %2, %cst_5 [1] : vector<64x8xf32> to vector<64xf32>
    %6 = vector.shape_cast %5 : vector<64xf32> to vector<64x1xf32>
    %7 = arith.mulf %2, %2 : vector<64x8xf32>
    %cst_6 = arith.constant dense<0.000000e+00> : vector<64xf32>
    %8 = vector.multi_reduction <add>, %7, %cst_6 [1] : vector<64x8xf32> to vector<64xf32>
    %9 = vector.shape_cast %8 : vector<64xf32> to vector<64x1xf32>
    %cst_7 = arith.constant 1.250000e-01 : f32
    %10 = vector.broadcast %cst_7 : f32 to vector<64x1xf32>
    %11 = arith.mulf %6, %10 : vector<64x1xf32>
    %cst_8 = arith.constant 1.250000e-01 : f32
    %12 = vector.broadcast %cst_8 : f32 to vector<64x1xf32>
    %13 = arith.mulf %9, %12 : vector<64x1xf32>
    %14 = arith.mulf %11, %11 : vector<64x1xf32>
    %15 = arith.subf %13, %14 : vector<64x1xf32>
    %cst_9 = arith.constant 0.000000e+00 : f32
    %16 = vector.broadcast %cst_9 : f32 to vector<64x1xf32>
    %17 = arith.maximumf %15, %16 : vector<64x1xf32>
    %cst_10 = arith.constant 9.99999974E-6 : f32
    %18 = vector.broadcast %cst_10 : f32 to vector<64x1xf32>
    %19 = arith.addf %17, %18 : vector<64x1xf32>
    %20 = math.rsqrt %19 : vector<64x1xf32>
    %21 = arith.mulf %20, %3 : vector<64x1xf32>
    %22 = vector.broadcast %11 : vector<64x1xf32> to vector<64x8xf32>
    %23 = arith.subf %2, %22 : vector<64x8xf32>
    %24 = vector.broadcast %21 : vector<64x1xf32> to vector<64x8xf32>
    %25 = arith.mulf %23, %24 : vector<64x8xf32>
    %26 = vector.broadcast %4 : vector<64x1xf32> to vector<64x8xf32>
    %27 = arith.addf %25, %26 : vector<64x8xf32>
    %cst_11 = arith.constant 0.000000e+00 : f32
    %28 = vector.broadcast %cst_11 : f32 to vector<64x8xf32>
    %29 = arith.maximumf %27, %28 : vector<64x8xf32>
    %c64_12 = arith.constant 64 : index
    %c0_13 = arith.constant 0 : index
    %30 = vector.load %arg1[%c64_12, %c0_13] : memref<136x128xf32, #tpu.memory_space<vmem>>, vector<32x64xf32>
    %cst_14 = arith.constant dense<0.000000e+00> : vector<32x8xf32>
    %31 = tpu.matmul %30, %29, %cst_14 {dimension_numbers = #tpu.dot_dimension_numbers<[1], [0], [0], [1], [0, 0, 1, 1], [], []>} : vector<32x64xf32>, vector<64x8xf32>, vector<32x8xf32> -> vector<32x8xf32>
    %c0_15 = arith.constant 0 : index
    %c66 = arith.constant 66 : index
    %32 = vector.load %arg1[%c0_15, %c66] : memref<136x128xf32, #tpu.memory_space<vmem>>, vector<32x1xf32>
    %c0_16 = arith.constant 0 : index
    %c67 = arith.constant 67 : index
    %33 = vector.load %arg1[%c0_16, %c67] : memref<136x128xf32, #tpu.memory_space<vmem>>, vector<32x1xf32>
    %cst_17 = arith.constant dense<0.000000e+00> : vector<32xf32>
    %34 = vector.multi_reduction <add>, %31, %cst_17 [1] : vector<32x8xf32> to vector<32xf32>
    %35 = vector.shape_cast %34 : vector<32xf32> to vector<32x1xf32>
    %36 = arith.mulf %31, %31 : vector<32x8xf32>
    %cst_18 = arith.constant dense<0.000000e+00> : vector<32xf32>
    %37 = vector.multi_reduction <add>, %36, %cst_18 [1] : vector<32x8xf32> to vector<32xf32>
    %38 = vector.shape_cast %37 : vector<32xf32> to vector<32x1xf32>
    %cst_19 = arith.constant 1.250000e-01 : f32
    %39 = vector.broadcast %cst_19 : f32 to vector<32x1xf32>
    %40 = arith.mulf %35, %39 : vector<32x1xf32>
    %cst_20 = arith.constant 1.250000e-01 : f32
    %41 = vector.broadcast %cst_20 : f32 to vector<32x1xf32>
    %42 = arith.mulf %38, %41 : vector<32x1xf32>
    %43 = arith.mulf %40, %40 : vector<32x1xf32>
    %44 = arith.subf %42, %43 : vector<32x1xf32>
    %cst_21 = arith.constant 0.000000e+00 : f32
    %45 = vector.broadcast %cst_21 : f32 to vector<32x1xf32>
    %46 = arith.maximumf %44, %45 : vector<32x1xf32>
    %cst_22 = arith.constant 9.99999974E-6 : f32
    %47 = vector.broadcast %cst_22 : f32 to vector<32x1xf32>
    %48 = arith.addf %46, %47 : vector<32x1xf32>
    %49 = math.rsqrt %48 : vector<32x1xf32>
    %50 = arith.mulf %49, %32 : vector<32x1xf32>
    %51 = vector.broadcast %40 : vector<32x1xf32> to vector<32x8xf32>
    %52 = arith.subf %31, %51 : vector<32x8xf32>
    %53 = vector.broadcast %50 : vector<32x1xf32> to vector<32x8xf32>
    %54 = arith.mulf %52, %53 : vector<32x8xf32>
    %55 = vector.broadcast %33 : vector<32x1xf32> to vector<32x8xf32>
    %56 = arith.addf %54, %55 : vector<32x8xf32>
    %cst_23 = arith.constant 0.000000e+00 : f32
    %57 = vector.broadcast %cst_23 : f32 to vector<32x8xf32>
    %58 = arith.maximumf %56, %57 : vector<32x8xf32>
    %c96 = arith.constant 96 : index
    %c0_24 = arith.constant 0 : index
    %59 = vector.load %arg1[%c96, %c0_24] : memref<136x128xf32, #tpu.memory_space<vmem>>, vector<32x32xf32>
    %cst_25 = arith.constant dense<0.000000e+00> : vector<32x8xf32>
    %60 = tpu.matmul %59, %58, %cst_25 {dimension_numbers = #tpu.dot_dimension_numbers<[1], [0], [0], [1], [0, 0, 1, 1], [], []>} : vector<32x32xf32>, vector<32x8xf32>, vector<32x8xf32> -> vector<32x8xf32>
    %c0_26 = arith.constant 0 : index
    %c68 = arith.constant 68 : index
    %61 = vector.load %arg1[%c0_26, %c68] : memref<136x128xf32, #tpu.memory_space<vmem>>, vector<32x1xf32>
    %c0_27 = arith.constant 0 : index
    %c69 = arith.constant 69 : index
    %62 = vector.load %arg1[%c0_27, %c69] : memref<136x128xf32, #tpu.memory_space<vmem>>, vector<32x1xf32>
    %cst_28 = arith.constant dense<0.000000e+00> : vector<32xf32>
    %63 = vector.multi_reduction <add>, %60, %cst_28 [1] : vector<32x8xf32> to vector<32xf32>
    %64 = vector.shape_cast %63 : vector<32xf32> to vector<32x1xf32>
    %65 = arith.mulf %60, %60 : vector<32x8xf32>
    %cst_29 = arith.constant dense<0.000000e+00> : vector<32xf32>
    %66 = vector.multi_reduction <add>, %65, %cst_29 [1] : vector<32x8xf32> to vector<32xf32>
    %67 = vector.shape_cast %66 : vector<32xf32> to vector<32x1xf32>
    %cst_30 = arith.constant 1.250000e-01 : f32
    %68 = vector.broadcast %cst_30 : f32 to vector<32x1xf32>
    %69 = arith.mulf %64, %68 : vector<32x1xf32>
    %cst_31 = arith.constant 1.250000e-01 : f32
    %70 = vector.broadcast %cst_31 : f32 to vector<32x1xf32>
    %71 = arith.mulf %67, %70 : vector<32x1xf32>
    %72 = arith.mulf %69, %69 : vector<32x1xf32>
    %73 = arith.subf %71, %72 : vector<32x1xf32>
    %cst_32 = arith.constant 0.000000e+00 : f32
    %74 = vector.broadcast %cst_32 : f32 to vector<32x1xf32>
    %75 = arith.maximumf %73, %74 : vector<32x1xf32>
    %cst_33 = arith.constant 9.99999974E-6 : f32
    %76 = vector.broadcast %cst_33 : f32 to vector<32x1xf32>
    %77 = arith.addf %75, %76 : vector<32x1xf32>
    %78 = math.rsqrt %77 : vector<32x1xf32>
    %79 = arith.mulf %78, %61 : vector<32x1xf32>
    %80 = vector.broadcast %69 : vector<32x1xf32> to vector<32x8xf32>
    %81 = arith.subf %60, %80 : vector<32x8xf32>
    %82 = vector.broadcast %79 : vector<32x1xf32> to vector<32x8xf32>
    %83 = arith.mulf %81, %82 : vector<32x8xf32>
    %84 = vector.broadcast %62 : vector<32x1xf32> to vector<32x8xf32>
    %85 = arith.addf %83, %84 : vector<32x8xf32>
    %cst_34 = arith.constant 0.000000e+00 : f32
    %86 = vector.broadcast %cst_34 : f32 to vector<32x8xf32>
    %87 = arith.maximumf %85, %86 : vector<32x8xf32>
    %c128 = arith.constant 128 : index
    %c0_35 = arith.constant 0 : index
    %88 = vector.load %arg1[%c128, %c0_35] : memref<136x128xf32, #tpu.memory_space<vmem>>, vector<5x32xf32>
    %cst_36 = arith.constant dense<0.000000e+00> : vector<5x8xf32>
    %89 = tpu.matmul %88, %87, %cst_36 {dimension_numbers = #tpu.dot_dimension_numbers<[1], [0], [0], [1], [0, 0, 1, 1], [], []>} : vector<5x32xf32>, vector<32x8xf32>, vector<5x8xf32> -> vector<5x8xf32>
    %c0_37 = arith.constant 0 : index
    %c70 = arith.constant 70 : index
    %90 = vector.load %arg1[%c0_37, %c70] : memref<136x128xf32, #tpu.memory_space<vmem>>, vector<5x1xf32>
    %c0_38 = arith.constant 0 : index
    %c71 = arith.constant 71 : index
    %91 = vector.load %arg1[%c0_38, %c71] : memref<136x128xf32, #tpu.memory_space<vmem>>, vector<5x1xf32>
    %cst_39 = arith.constant dense<0.000000e+00> : vector<5xf32>
    %92 = vector.multi_reduction <add>, %89, %cst_39 [1] : vector<5x8xf32> to vector<5xf32>
    %93 = vector.shape_cast %92 : vector<5xf32> to vector<5x1xf32>
    %94 = arith.mulf %89, %89 : vector<5x8xf32>
    %cst_40 = arith.constant dense<0.000000e+00> : vector<5xf32>
    %95 = vector.multi_reduction <add>, %94, %cst_40 [1] : vector<5x8xf32> to vector<5xf32>
    %96 = vector.shape_cast %95 : vector<5xf32> to vector<5x1xf32>
    %cst_41 = arith.constant 1.250000e-01 : f32
    %97 = vector.broadcast %cst_41 : f32 to vector<5x1xf32>
    %98 = arith.mulf %93, %97 : vector<5x1xf32>
    %cst_42 = arith.constant 1.250000e-01 : f32
    %99 = vector.broadcast %cst_42 : f32 to vector<5x1xf32>
    %100 = arith.mulf %96, %99 : vector<5x1xf32>
    %101 = arith.mulf %98, %98 : vector<5x1xf32>
    %102 = arith.subf %100, %101 : vector<5x1xf32>
    %cst_43 = arith.constant 0.000000e+00 : f32
    %103 = vector.broadcast %cst_43 : f32 to vector<5x1xf32>
    %104 = arith.maximumf %102, %103 : vector<5x1xf32>
    %cst_44 = arith.constant 9.99999974E-6 : f32
    %105 = vector.broadcast %cst_44 : f32 to vector<5x1xf32>
    %106 = arith.addf %104, %105 : vector<5x1xf32>
    %107 = math.rsqrt %106 : vector<5x1xf32>
    %108 = arith.mulf %107, %90 : vector<5x1xf32>
    %109 = vector.broadcast %98 : vector<5x1xf32> to vector<5x8xf32>
    %110 = arith.subf %89, %109 : vector<5x8xf32>
    %111 = vector.broadcast %108 : vector<5x1xf32> to vector<5x8xf32>
    %112 = arith.mulf %110, %111 : vector<5x8xf32>
    %113 = vector.broadcast %91 : vector<5x1xf32> to vector<5x8xf32>
    %114 = arith.addf %112, %113 : vector<5x8xf32>
    %cst_45 = arith.constant dense<0xFF800000> : vector<8xf32>
    %115 = vector.multi_reduction <maximumf>, %114, %cst_45 [0] : vector<5x8xf32> to vector<8xf32>
    %116 = vector.shape_cast %115 : vector<8xf32> to vector<1x8xf32>
    %117 = vector.broadcast %116 : vector<1x8xf32> to vector<5x8xf32>
    %118 = arith.subf %114, %117 : vector<5x8xf32>
    %119 = math.exp %118 : vector<5x8xf32>
    %cst_46 = arith.constant dense<0.000000e+00> : vector<8xf32>
    %120 = vector.multi_reduction <add>, %119, %cst_46 [0] : vector<5x8xf32> to vector<8xf32>
    %121 = vector.shape_cast %120 : vector<8xf32> to vector<1x8xf32>
    %122 = tpu.reciprocal %121 : vector<1x8xf32> -> vector<1x8xf32>
    %123 = vector.broadcast %122 : vector<1x8xf32> to vector<5x8xf32>
    %124 = arith.mulf %119, %123 : vector<5x8xf32>
    %c0_47 = arith.constant 0 : index
    %c0_48 = arith.constant 0 : index
    %125 = vector.load %arg2[%c0_47, %c0_48] : memref<5x8xf32, #tpu.memory_space<vmem>>, vector<5x8xf32>
    tpu.vector_store %arg2[%c0_47, %c0_48], %124 {strides = array<i32>} : memref<5x8xf32, #tpu.memory_space<vmem>>, vector<5x8xf32>,
    return
  }
}

</mosaic_0001>

<bundles_post_ra>
// kernel: tpu_custom_call.1
= control target key start
LH: loop header
LB: loop body
LE: loop exit
PB: predicated region body
PF: predicated region fallthrough
CT: control target
= control target key end

     0   :  { %7 = vsyncpa [#allocation3], 0  ;;  %s1444_s0 = inlined_call_operand.hbm [shape: f32[8,16], index: 0, kind: input, shape index: {}]   ;;  %s1445_s1 = inlined_call_operand.hbm [shape: f32[136,128], index: 1, kind: input, shape index: {}]   ;;  %s1446_s2 = inlined_call_operand.hbm [shape: f32[5,8], index: 2, kind: output, shape index: {}]  }
   0x1   :  { %8 = vsyncpa [#allocation6], 0 }
   0x2   :  { %9 = vsyncpa [#allocation4], 0  ;;  %s15_s11 = sshll.u32 %s1444_s0, 4  ;;  %s1102_s12 = smov [#allocation2]   ;;  %s16_s11 = int_to_ptr.hbm [resolvable:$true] %s15_s11 }
   0x3   :  { %s17_s13 = sshll.u32 %s1102_s12, 4  ;;  %s25_s16 = sshll.u32 %s1445_s1, 4  ;;  %s18_s13 = int_to_ptr.vmem [resolvable:$true] %s17_s13  ;;  %s26_s16 = int_to_ptr.hbm [resolvable:$true] %s25_s16 }
   0x4   :  { %20 = dma.hbm_to_vmem [thread:$0]  %s16_s11, 128, %s18_s13, [#allocation3]  }
   0x5   :  { %s1103_s17 = smov [#allocation5]   ;;  %s1104_s19 = smov 128  }
   0x6   :  { %s27_s18 = sshll.u32 %s1103_s17, 4  ;;  %s1105_s20 = smov 8   ;;  %s28_s18 = int_to_ptr.vmem [resolvable:$true] %s27_s18 }
   0x7   :  { %33 = dma.hbm_to_vmem [thread:$0]  %s26_s16, 2176, %s28_s18, [#allocation6], %s1104_s19, %s1104_s19, %s1105_s20  }
   0x8   :  { %1096 = dma.done.wait [#allocation3], 128  }
   0x9   :  { %1097 = vsyncadd [#allocation3], 4294967168 }
   0xa   :  { %1098 = dma.done.wait [#allocation6], 2176  }
   0xb   :  { %1099 = vsyncadd [#allocation6], 4294965120  ;;  %vm51_vm0 = vcmask 130048   ;;  %v42_v0 = vld [vmem:[#allocation2] sm:$0xff]  ;;  %v1138_v1 = vld [vmem:[#allocation5] sm:$0xff]  ;;  %v1106_v10 = vmov 65  }
   0xc   :  { %927 = vmatpush.xpose.msk.msra.mxu0 %vm51_vm0, %v42_v0  ;;  %945 = vmatpush.xpose.msk.msra.mxu3 %vm51_vm0, %v42_v0  ;;  %v1140_v2 = vld [vmem:[#allocation5 + $0x28] sm:$0xff]  ;;  %v1148_v4 = vld [vmem:[#allocation5 + $0x30] sm:$0xff]  ;;  %v1156_v6 = vld [vmem:[#allocation5 + $0x38] sm:$0xff]  ;;  %vm120_vm1 = vcmask 64512   ;;  %v1107_v42 = vmov 64   ;;  %s1114_s0 = smov [#allocation7]  }
   0xd   :  { %v1146_v3 = vld [vmem:[#allocation5 + $0x8] sm:$0xff]  ;;  %v1154_v5 = vld [vmem:[#allocation5 + $0x10] sm:$0xff]  ;;  %v1162_v7 = vld [vmem:[#allocation5 + $0x18] sm:$0xff]  ;;  %960 = vset.pattern.permute.xlu1 %v1106_v10  ;;  %961 = vset.pattern.permute.xlu2 %v1106_v10  ;;  %s914_s1 = sshll.u32 %s1114_s0, 4  ;;  %s916_s23 = sshll.u32 %s1446_s2, 4  ;;  %s915_s1 = int_to_ptr.vmem [resolvable:$true] %s914_s1  ;;  %s917_s23 = int_to_ptr.hbm [resolvable:$true] %s916_s23 }
   0xe   :  { %v1166_v8 = vld [vmem:[#allocation5 + $0x20] sm:$0xff]  ;;  %959 = vset.pattern.permute.xlu0 %v1106_v10 }
   0xf   :  { %928 = vmatmul.msk.f32.vlgmr.msra.gmra.mxu0 %vm51_vm0, %v1138_v1  ;;  %933 = vmatmul.msk.f32.vlgmr.msra.gmra.mxu3 %vm51_vm0, %v1140_v2 }
  0x17   :  { %929 = vmatmul.msk.f32.gmra.mxu0 %vm51_vm0, %v1146_v3  ;;  %934 = vmatmul.msk.f32.gmra.mxu3 %vm51_vm0, %v1148_v4 }
  0x1f   :  { %930 = vmatmul.msk.f32.gmra.mxu0 %vm51_vm0, %v1154_v5  ;;  %935 = vmatmul.msk.f32.gmra.mxu3 %vm51_vm0, %v1156_v6 }
  0x27   :  { %931 = vmatmul.msk.f32.gmra.mxu0 %vm51_vm0, %v1162_v7 }
  0x2f   :  { %932 = vmatmul.msk.f32.gmra.mxu0 %vm51_vm0, %v1166_v8 }
  0x8c   :  { %v1170_v9 = vpop.f32.mrf.mxu0 }
  0x8d   :  { %v121_v18 = vsel %vm120_vm1, %v1170_v9, 0.0  ;;  %v145_v30 = vmul.f32 %v1170_v9, %v1170_v9 }
  0x8f   :  { %v153_v31 = vsel %vm120_vm1, %v145_v30, 0.0 }
  0x92   :  { %v1175_v11 = vpop.f32.mrf.mxu3 }
  0x93   :  { %v136_v12 = vsel %vm120_vm1, %v1175_v11, 0.0  ;;  %v150_v13 = vmul.f32 %v1175_v11, %v1175_v11 }
  0x94   :  { %137 = vadd.xlane.f32.xlu1 %v136_v12  ;;  %v1181_v14 = vpop.f32.mrf.mxu0 }
  0x95   :  { %v168_v15 = vsel %vm120_vm1, %v150_v13, 0.0  ;;  %v124_v16 = vsel %vm120_vm1, %v1181_v14, 0.0  ;;  %v146_v23 = vmul.f32 %v1181_v14, %v1181_v14 }
  0x96   :  { %169 = vadd.xlane.f32.xlu0 %v168_v15  ;;  %125 = vadd.xlane.f32.xlu2 %v124_v16 }
  0x97   :  { %v156_v25 = vsel %vm120_vm1, %v146_v23, 0.0 }
  0x9a   :  { %v1186_v17 = vpop.f32.mrf.mxu3 }
  0x9b   :  { %v139_v19 = vsel %vm120_vm1, %v1186_v17, 0.0  ;;  %v151_v20 = vmul.f32 %v1186_v17, %v1186_v17 }
  0x9c   :  { %122 = vadd.xlane.f32.xlu1 %v121_v18  ;;  %v1195_v22 = vpop.f32.mrf.mxu0 }
  0x9d   :  { %v171_v21 = vsel %vm120_vm1, %v151_v20, 0.0  ;;  %v127_v24 = vsel %vm120_vm1, %v1195_v22, 0.0  ;;  %v147_v28 = vmul.f32 %v1195_v22, %v1195_v22 }
  0x9e   :  { %140 = vadd.xlane.f32.xlu0 %v139_v19  ;;  %172 = vadd.xlane.f32.xlu2 %v171_v21 }
  0x9f   :  { %v159_v29 = vsel %vm120_vm1, %v147_v28, 0.0 }
  0xa2   :  { %v1202_v26 = vpop.f32.mrf.mxu3 }
  0xa3   :  { %v142_v27 = vsel %vm120_vm1, %v1202_v26, 0.0  ;;  %v152_v33 = vmul.f32 %v1202_v26, %v1202_v26 }
  0xa4   :  { %v1215_v32 = vpop.f32.mrf.mxu0 }
  0xa5   :  { %v174_v34 = vsel %vm120_vm1, %v152_v33, 0.0  ;;  %v130_v36 = vsel %vm120_vm1, %v1215_v32, 0.0  ;;  %v148_v39 = vmul.f32 %v1215_v32, %v1215_v32 }
  0xa6   :  { %157 = vadd.xlane.f32.xlu2 %v156_v25  ;;  %128 = vadd.xlane.f32.xlu0 %v127_v24 }
  0xa7   :  { %v162_v41 = vsel %vm120_vm1, %v148_v39, 0.0 }
  0xac   :  { %v1220_v35 = vpop.f32.mrf.mxu0 }
  0xad   :  { %v133_v37 = vsel %vm120_vm1, %v1220_v35, 0.0  ;;  %v149_v38 = vmul.f32 %v1220_v35, %v1220_v35 }
  0xae   :  { %143 = vadd.xlane.f32.xlu0 %v142_v27 }
  0xaf   :  { %v165_v40 = vsel %vm120_vm1, %v149_v38, 0.0 }
  0xb5   :  { %394 = vperm.xlu1 %960, %v1148_v4  }
  0xb6   :  { %160 = vadd.xlane.f32.xlu0 %v159_v29 }
  0xbe   :  { %382 = vperm.xlu2 %961, %v1162_v7   ;;  %154 = vadd.xlane.f32.xlu0 %v153_v31 }
  0xc6   :  { %962 = vset.pattern.permute.xlu2 %v1107_v42 }
  0xd2   :  { %398 = vperm.xlu0 %959, %v1156_v6  }
  0xda   :  { %963 = vset.pattern.permute.xlu0 %v1107_v42 }
  0xdf   :  { %175 = vadd.xlane.f32.xlu1 %v174_v34 }
  0xe7   :  { %131 = vadd.xlane.f32.xlu1 %v130_v36  ;;  %134 = vadd.xlane.f32.xlu2 %v133_v37 }
  0xef   :  { %163 = vadd.xlane.f32.xlu1 %v162_v41  ;;  %166 = vadd.xlane.f32.xlu2 %v165_v40 }
 0x107   :  { %v138_v43 = vpop.xlane.xlu1 %137 }
 0x108   :  { %v1232_v44 = vmul.f32 0.125, %v138_v43  ;;  %390 = vperm.xlu1 %960, %v1140_v2  }
 0x109   :  { %v170_v45 = vpop.xlane.xlu0 %169  ;;  %v1235_v46 = vpop.xlane.xlu2 %125 }
 0x10a   :  { %v198_v47 = vmul.f32 %v1232_v44, %v1232_v44  ;;  %v190_v48 = vmul.f32 0.125, %v170_v45 }
 0x10c   :  { %v206_v49 = vsub.f32 %v190_v48, %v198_v47 }
 0x10e   :  { %v214_v50 = vmax.f32 %v206_v49, 0.0  ;;  %v1252_v49 = vmul.f32 0.125, %v1235_v46 }
 0x10f   :  { %v123_v43 = vpop.xlane.xlu1 %122 }
 0x110   :  { %v222_v51 = vadd.f32 1e-05, %v214_v50  ;;  %386 = vperm.xlu1 %960, %v1166_v8   ;;  %v194_v50 = vmul.f32 %v1252_v49, %v1252_v49 }
 0x111   :  { %v141_v52 = vpop.xlane.xlu0 %140  ;;  %v173_v54 = vpop.xlane.xlu2 %172 }
 0x112   :  { %982 = vrsqrt.f32 %v222_v51  ;;  %v1240_v53 = vmul.f32 0.125, %v141_v52  ;;  %v191_v55 = vmul.f32 0.125, %v173_v54  ;;  %vm281_vm3 = vweird.f32 %v222_v51 }
 0x114   :  { %v199_v56 = vmul.f32 %v1240_v53, %v1240_v53 }
 0x116   :  { %v207_v57 = vsub.f32 %v191_v55, %v199_v56  ;;  %v1258_v55 = vmul.f32 0.125, %v123_v43 }
 0x118   :  { %v983_v58 = vpop.eup %982  ;;  %v215_v59 = vmax.f32 %v207_v57, 0.0  ;;  %964 = vset.pattern.permute.xlu1 %v1107_v42 }
 0x119   :  { %v276_v60 = vmul.f32 %v983_v58, %v222_v51  ;;  %v129_v61 = vpop.xlane.xlu0 %128  ;;  %vm282_vm2 = vweird.f32 %v983_v58  ;;  %v158_v45 = vpop.xlane.xlu2 %157 }
 0x11a   :  { %v223_v62 = vadd.f32 1e-05, %v215_v59  ;;  %vm283_vm4 = vmor %vm281_vm3, %vm282_vm2  ;;  %v1245_v23 = vmul.f32 0.125, %v129_v61 }
 0x11b   :  { %v277_v63 = vmul.f32 %v983_v58, %v276_v60 }
 0x11c   :  { %984 = vrsqrt.f32 %v223_v62  ;;  %v195_v25 = vmul.f32 %v1245_v23, %v1245_v23  ;;  %vm291_vm5 = vweird.f32 %v223_v62 }
 0x11d   :  { %v278_v0 = vmul.f32 0.5, %v277_v63 }
 0x11f   :  { %v279_v12 = vsub.f32 1.5, %v278_v0 }
 0x121   :  { %v144_v13 = vpop.xlane.xlu0 %143  ;;  %v280_v15 = vmul.f32 %v983_v58, %v279_v12 }
 0x122   :  { %v985_v16 = vpop.eup %984  ;;  %v1263_v46 = vmul.f32 0.125, %v144_v13 }
 0x123   :  { %v286_v18 = vmul.f32 %v985_v16, %v223_v62  ;;  %v284_v19 = vsel %vm283_vm4, %v983_v58, %v280_v15  ;;  %vm292_vm6 = vweird.f32 %v985_v16  ;;  %v193_v58 = vmul.f32 %v1258_v55, %v1258_v55  ;;  %v1268_v62 = vpop.permute.xlu2 %382 }
 0x124   :  { %v310_v20 = vmul.f32 %v284_v19, %v1140_v2  ;;  %vm293_vm7 = vmor %vm291_vm5, %vm292_vm6  ;;  %v200_v60 = vmul.f32 %v1263_v46, %v1263_v46 }
 0x125   :  { %v287_v21 = vmul.f32 %v985_v16, %v286_v18 }
 0x126   :  { %348 = vperm.xlu2 %962, %v310_v20  }
 0x127   :  { %v288_v24 = vmul.f32 0.5, %v287_v21  ;;  %v1256_v52 = vpop.permute.xlu1 %394 }
 0x129   :  { %v289_v27 = vsub.f32 1.5, %v288_v24  ;;  %v161_v28 = vpop.xlane.xlu0 %160 }
 0x12a   :  { %v187_v29 = vmul.f32 0.125, %v161_v28 }
 0x12b   :  { %v290_v30 = vmul.f32 %v985_v16, %v289_v27 }
 0x12c   :  { %v203_v31 = vsub.f32 %v187_v29, %v195_v25 }
 0x12d   :  { %v294_v33 = vsel %vm293_vm7, %v985_v16, %v290_v30 }
 0x12e   :  { %v211_v34 = vmax.f32 %v203_v31, 0.0  ;;  %v311_v2 = vmul.f32 %v294_v33, %v1148_v4  ;;  %v186_v4 = vmul.f32 0.125, %v158_v45 }
 0x130   :  { %v219_v36 = vadd.f32 1e-05, %v211_v34  ;;  %353 = vperm.xlu2 %962, %v311_v2   ;;  %v202_v51 = vsub.f32 %v186_v4, %v194_v50 }
 0x131   :  { %v155_v54 = vpop.xlane.xlu0 %154 }
 0x132   :  { %986 = vrsqrt.f32 %v219_v36  ;;  %vm251_vm8 = vweird.f32 %v219_v36  ;;  %v210_v56 = vmax.f32 %v202_v51, 0.0  ;;  %v185_v57 = vmul.f32 0.125, %v155_v54 }
 0x134   :  { %v218_v59 = vadd.f32 1e-05, %v210_v56  ;;  %v201_v61 = vsub.f32 %v185_v57, %v193_v58 }
 0x136   :  { %988 = vrsqrt.f32 %v218_v59  ;;  %v209_v12 = vmax.f32 %v201_v61, 0.0  ;;  %vm241_vm15 = vweird.f32 %v218_v59 }
 0x138   :  { %v987_v37 = vpop.eup %986  ;;  %v1270_v18 = vadd.f32 1e-05, %v209_v12 }
 0x139   :  { %v246_v38 = vmul.f32 %v987_v37, %v219_v36  ;;  %vm252_vm9 = vweird.f32 %v987_v37 }
 0x13a   :  { %vm253_vm10 = vmor %vm251_vm8, %vm252_vm9  ;;  %vm231_vm3 = vweird.f32 %v1270_v18 }
 0x13b   :  { %v247_v39 = vmul.f32 %v987_v37, %v246_v38 }
 0x13c   :  { %v989_v21 = vpop.eup %988 }
 0x13d   :  { %v248_v40 = vmul.f32 0.5, %v247_v39  ;;  %v236_v24 = vmul.f32 %v989_v21, %v218_v59  ;;  %vm242_vm14 = vweird.f32 %v989_v21 }
 0x13e   :  { %vm243_vm0 = vmor %vm241_vm15, %vm242_vm14 }
 0x13f   :  { %v249_v41 = vsub.f32 1.5, %v248_v40  ;;  %v237_v30 = vmul.f32 %v989_v21, %v236_v24 }
 0x141   :  { %v250_v42 = vmul.f32 %v987_v37, %v249_v41 }
 0x143   :  { %v254_v47 = vsel %vm253_vm10, %v987_v37, %v250_v42  ;;  %v238_v42 = vmul.f32 0.5, %v237_v30 }
 0x144   :  { %v307_v48 = vmul.f32 %v254_v47, %v1154_v5 }
 0x145   :  { %v239_v54 = vsub.f32 1.5, %v238_v42 }
 0x146   :  { %333 = vperm.xlu0 %963, %v307_v48  }
 0x14e   :  { %966 = vset.pattern.permute.xlu0 %v1106_v10 }
 0x14f   :  { %374 = vperm.xlu0 %966, %v1146_v3  }
 0x152   :  { %v176_v63 = vpop.xlane.xlu1 %175 }
 0x153   :  { %v192_v0 = vmul.f32 0.125, %v176_v63  ;;  %v240_v63 = vmul.f32 %v989_v21, %v239_v54 }
 0x155   :  { %v208_v15 = vsub.f32 %v192_v0, %v200_v60 }
 0x157   :  { %v216_v16 = vmax.f32 %v208_v15, 0.0 }
 0x159   :  { %v224_v19 = vadd.f32 1e-05, %v216_v16 }
 0x15a   :  { %v132_v13 = vpop.xlane.xlu1 %131  ;;  %v135_v20 = vpop.xlane.xlu2 %134 }
 0x15b   :  { %990 = vrsqrt.f32 %v224_v19  ;;  %v1273_v25 = vmul.f32 0.125, %v132_v13  ;;  %v1275_v27 = vmul.f32 0.125, %v135_v20  ;;  %vm301_vm12 = vweird.f32 %v224_v19 }
 0x15c   :  { %992 = vrsqrt.f32 %v1270_v18  ;;  %v244_v13 = vsel %vm243_vm0, %v989_v21, %v240_v63 }
 0x15d   :  { %v197_v29 = vmul.f32 %v1275_v27, %v1275_v27  ;;  %v196_v36 = vmul.f32 %v1273_v25, %v1273_v25 }
 0x161   :  { %v991_v28 = vpop.eup %990 }
 0x162   :  { %v296_v31 = vmul.f32 %v991_v28, %v224_v19  ;;  %v164_v33 = vpop.xlane.xlu1 %163  ;;  %v167_v34 = vpop.xlane.xlu2 %166  ;;  %vm302_vm11 = vweird.f32 %v991_v28 }
 0x163   :  { %v993_v2 = vpop.eup %992  ;;  %v188_v37 = vmul.f32 0.125, %v164_v33  ;;  %v189_v38 = vmul.f32 0.125, %v167_v34  ;;  %vm303_vm13 = vmor %vm301_vm12, %vm302_vm11  ;;  %vm421_vm11 = vcmask 523264  }
 0x164   :  { %v297_v39 = vmul.f32 %v991_v28, %v296_v31  ;;  %v226_v43 = vmul.f32 %v993_v2, %v1270_v18  ;;  %vm232_vm2 = vweird.f32 %v993_v2 }
 0x165   :  { %v204_v40 = vsub.f32 %v188_v37, %v196_v36  ;;  %v205_v41 = vsub.f32 %v189_v38, %v197_v29  ;;  %v306_v29 = vmul.f32 %v244_v13, %v1146_v3  ;;  %vm233_vm5 = vmor %vm231_vm3, %vm232_vm2 }
 0x166   :  { %v298_v45 = vmul.f32 0.5, %v297_v39  ;;  %v227_v56 = vmul.f32 %v993_v2, %v226_v43 }
 0x167   :  { %v212_v47 = vmax.f32 %v204_v40, 0.0  ;;  %v213_v48 = vmax.f32 %v205_v41, 0.0 }
 0x168   :  { %v299_v4 = vsub.f32 1.5, %v298_v45  ;;  %v228_v61 = vmul.f32 0.5, %v227_v56  ;;  %v316_v56 = vsub.f32 %v1215_v32, %v1273_v25 }
 0x169   :  { %v220_v50 = vadd.f32 1e-05, %v212_v47  ;;  %v221_v51 = vadd.f32 1e-05, %v213_v48  ;;  %v399_v47 = vpop.permute.xlu0 %398 }
 0x16a   :  { %v300_v57 = vmul.f32 %v991_v28, %v299_v4  ;;  %v229_v15 = vsub.f32 1.5, %v228_v61 }
 0x16b   :  { %994 = vrsqrt.f32 %v220_v50  ;;  %vm261_vm6 = vweird.f32 %v220_v50  ;;  %vm271_vm9 = vweird.f32 %v221_v51 }
 0x16c   :  { %996 = vrsqrt.f32 %v221_v51  ;;  %v304_v58 = vsel %vm303_vm13, %v991_v28, %v300_v57  ;;  %v230_v28 = vmul.f32 %v993_v2, %v229_v15 }
 0x16d   :  { %v312_v60 = vmul.f32 %v304_v58, %v1156_v6 }
 0x16e   :  { %v234_v33 = vsel %vm233_vm5, %v993_v2, %v230_v28  ;;  %v319_v2 = vsub.f32 %v1186_v17, %v1240_v53  ;;  %v320_v17 = vsub.f32 %v1202_v26, %v1263_v46  ;;  %v314_v26 = vsub.f32 %v1181_v14, %v1252_v49  ;;  %v417_v28 = vld [vmem:[#allocation5 + $0x40] sm:$0xff] }
 0x16f   :  { %358 = vperm.xlu1 %964, %v312_v60   ;;  %v305_v36 = vmul.f32 %v234_v33, %v1138_v1  ;;  %v313_v14 = vsub.f32 %v1170_v9, %v1258_v55 }
 0x171   :  { %v995_v0 = vpop.eup %994 }
 0x172   :  { %v997_v12 = vpop.eup %996  ;;  %v256_v16 = vmul.f32 %v995_v0, %v220_v50  ;;  %vm262_vm4 = vweird.f32 %v995_v0 }
 0x173   :  { %v266_v20 = vmul.f32 %v997_v12, %v221_v51  ;;  %vm263_vm7 = vmor %vm261_vm6, %vm262_vm4  ;;  %vm272_vm8 = vweird.f32 %v997_v12 }
 0x174   :  { %v257_v19 = vmul.f32 %v995_v0, %v256_v16  ;;  %vm273_vm10 = vmor %vm271_vm9, %vm272_vm8  ;;  %vm623_vm9 = vcmask 261120  }
 0x175   :  { %v267_v24 = vmul.f32 %v997_v12, %v266_v20 }
 0x176   :  { %v258_v30 = vmul.f32 0.5, %v257_v19 }
 0x177   :  { %v268_v6 = vmul.f32 0.5, %v267_v24  ;;  %328 = vperm.xlu1 %964, %v306_v29  }
 0x178   :  { %v259_v31 = vsub.f32 1.5, %v258_v30 }
 0x179   :  { %v269_v59 = vsub.f32 1.5, %v268_v6  ;;  %v418_v6 = vld [vmem:[#allocation5 + $0x48] sm:$0xff] }
 0x17a   :  { %v260_v34 = vmul.f32 %v995_v0, %v259_v31  ;;  %v391_v45 = vpop.permute.xlu1 %390  ;;  %v419_v31 = vld [vmem:[#allocation5 + $0x50] sm:$0xff] }
 0x17b   :  { %v270_v38 = vmul.f32 %v997_v12, %v269_v59  ;;  %v420_v59 = vld [vmem:[#allocation5 + $0x58] sm:$0xff] }
 0x17c   :  { %v264_v21 = vsel %vm263_vm7, %v995_v0, %v260_v34 }
 0x17d   :  { %v308_v37 = vmul.f32 %v264_v21, %v1162_v7  ;;  %v274_v39 = vsel %vm273_vm10, %v997_v12, %v270_v38 }
 0x17e   :  { %v309_v40 = vmul.f32 %v274_v39, %v1166_v8  ;;  %v318_v8 = vsub.f32 %v1175_v11, %v1232_v44  ;;  %v315_v11 = vsub.f32 %v1195_v22, %v1245_v23 }
 0x17f   :  { %323 = vperm.xlu1 %964, %v305_v36   ;;  %338 = vperm.xlu2 %962, %v308_v37  }
 0x180   :  { %v349_v18 = vpop.permute.xlu2 %348 }
 0x181   :  { %v366_v51 = vmul.f32 %v349_v18, %v318_v8 }
 0x182   :  { %v387_v48 = vpop.permute.xlu1 %386 }
 0x183   :  { %v406_v63 = vadd.f32 %v391_v45, %v366_v51 }
 0x185   :  { %v414_v32 = vmax.f32 %v406_v63, 0.0 }
 0x187   :  { %343 = vperm.xlu2 %962, %v309_v40  }
 0x18a   :  { %v354_v41 = vpop.permute.xlu2 %353 }
 0x18b   :  { %v367_v42 = vmul.f32 %v354_v41, %v319_v2 }
 0x18d   :  { %v407_v43 = vadd.f32 %v1256_v52, %v367_v42 }
 0x18f   :  { %965 = vset.pattern.permute.xlu2 %v1106_v10  ;;  %v317_v10 = vsub.f32 %v1220_v35, %v1275_v27  ;;  %v415_v44 = vmax.f32 %v407_v43, 0.0 }
 0x190   :  { %378 = vperm.xlu2 %965, %v1154_v5  }
 0x198   :  { %370 = vperm.xlu2 %965, %v1138_v1  }
 0x1b8   :  { %v334_v54 = vpop.permute.xlu0 %333 }
 0x1b9   :  { %v363_v35 = vmul.f32 %v334_v54, %v315_v11 }
 0x1c1   :  { %v375_v15 = vpop.permute.xlu0 %374 }
 0x1d9   :  { %v339_v4 = vpop.permute.xlu2 %338 }
 0x1da   :  { %v364_v60 = vmul.f32 %v339_v4, %v316_v56 }
 0x1dc   :  { %v404_v25 = vadd.f32 %v1268_v62, %v364_v60 }
 0x1de   :  { %v412_v22 = vmax.f32 %v404_v25, 0.0 }
 0x1e1   :  { %v359_v53 = vpop.permute.xlu1 %358  ;;  %v344_v50 = vpop.permute.xlu2 %343 }
 0x1e2   :  { %v368_v52 = vmul.f32 %v359_v53, %v320_v17  ;;  %v365_v57 = vmul.f32 %v344_v50, %v317_v10  ;;  %v1109_v17 = vmov 66  }
 0x1e3   :  { %969 = vset.pattern.permute.xlu1 %v1109_v17 }
 0x1e4   :  { %v408_v58 = vadd.f32 %v399_v47, %v368_v52  ;;  %v405_v46 = vadd.f32 %v387_v48, %v365_v57  ;;  %v1108_v47 = vmov 67  }
 0x1e5   :  { %968 = vset.pattern.permute.xlu2 %v1108_v47  ;;  %967 = vset.pattern.permute.xlu0 %v1108_v47 }
 0x1e6   :  { %v416_v61 = vmax.f32 %v408_v58, 0.0  ;;  %v413_v13 = vmax.f32 %v405_v46, 0.0 }
 0x1e8   :  { %442 = vmatpush.msra.mxu1 %v416_v61 }
 0x1e9   :  { %v329_v0 = vpop.permute.xlu1 %328 }
 0x1ea   :  { %v362_v27 = vmul.f32 %v329_v0, %v314_v26  ;;  %443 = vmatpush.msra.mxu1 %v415_v44  ;;  %v379_v12 = vpop.permute.xlu2 %378 }
 0x1eb   :  { %v403_v16 = vadd.f32 %v379_v12, %v363_v35 }
 0x1ec   :  { %444 = vmatpush.msra.mxu1 %v414_v32  ;;  %v402_v20 = vadd.f32 %v375_v15, %v362_v27 }
 0x1ed   :  { %v411_v23 = vmax.f32 %v403_v16, 0.0 }
 0x1ee   :  { %445 = vmatpush.msra.mxu1 %v413_v13  ;;  %v410_v19 = vmax.f32 %v402_v20, 0.0 }
 0x1f0   :  { %446 = vmatpush.msra.mxu1 %v412_v22 }
 0x1f1   :  { %v324_v49 = vpop.permute.xlu1 %323 }
 0x1f2   :  { %v361_v24 = vmul.f32 %v324_v49, %v313_v14  ;;  %447 = vmatpush.msra.mxu1 %v411_v23  ;;  %v371_v29 = vpop.permute.xlu2 %370 }
 0x1f4   :  { %v401_v30 = vadd.f32 %v371_v29, %v361_v24  ;;  %448 = vmatpush.msra.mxu1 %v410_v19 }
 0x1f6   :  { %v409_v62 = vmax.f32 %v401_v30, 0.0 }
 0x1f8   :  { %449 = vmatpush.msra.mxu1 %v409_v62 }
 0x1f9   :  { %936 = vmatmul.msk.f32.vlgmr.msra.gmra.mxu1 %vm421_vm11, %v417_v28 }
 0x201   :  { %937 = vmatmul.msk.f32.gmra.mxu1 %vm421_vm11, %v418_v6 }
 0x209   :  { %938 = vmatmul.msk.f32.gmra.mxu1 %vm421_vm11, %v419_v31 }
 0x211   :  { %939 = vmatmul.msk.f32.gmra.mxu1 %vm421_vm11, %v420_v59 }
 0x276   :  { %v1309_v33 = vpop.f32.mrf.mxu1 }
 0x277   :  { %v479_v41 = vmul.f32 %v1309_v33, %v1309_v33  ;;  %v467_v43 = vsel %vm120_vm1, %v1309_v33, 0.0 }
 0x279   :  { %v483_v45 = vsel %vm120_vm1, %v479_v41, 0.0 }
 0x27e   :  { %v1311_v9 = vpop.f32.mrf.mxu1 }
 0x27f   :  { %v470_v55 = vsel %vm120_vm1, %v1311_v9, 0.0  ;;  %v480_v2 = vmul.f32 %v1311_v9, %v1311_v9 }
 0x280   :  { %471 = vadd.xlane.f32.xlu1 %v470_v55 }
 0x281   :  { %v486_v42 = vsel %vm120_vm1, %v480_v2, 0.0 }
 0x286   :  { %v1315_v34 = vpop.f32.mrf.mxu1 }
 0x287   :  { %v473_v21 = vsel %vm120_vm1, %v1315_v34, 0.0  ;;  %v481_v36 = vmul.f32 %v1315_v34, %v1315_v34 }
 0x288   :  { %474 = vadd.xlane.f32.xlu2 %v473_v21 }
 0x289   :  { %v489_v18 = vsel %vm120_vm1, %v481_v36, 0.0 }
 0x28e   :  { %v1321_v37 = vpop.f32.mrf.mxu1 }
 0x28f   :  { %v482_v38 = vmul.f32 %v1321_v37, %v1321_v37  ;;  %v476_v39 = vsel %vm120_vm1, %v1321_v37, 0.0 }
 0x290   :  { %490 = vadd.xlane.f32.xlu2 %v489_v18  ;;  %477 = vadd.xlane.f32.xlu1 %v476_v39 }
 0x291   :  { %v492_v40 = vsel %vm120_vm1, %v482_v38, 0.0 }
 0x292   :  { %493 = vadd.xlane.f32.xlu0 %v492_v40 }
 0x298   :  { %487 = vadd.xlane.f32.xlu2 %v486_v42  ;;  %468 = vadd.xlane.f32.xlu1 %v467_v43 }
 0x29a   :  { %484 = vadd.xlane.f32.xlu0 %v483_v45 }
 0x2ae   :  { %608 = vperm.xlu0 %967, %v1162_v7  }
 0x2b0   :  { %603 = vperm.xlu2 %968, %v1154_v5  }
 0x2b8   :  { %970 = vset.pattern.permute.xlu2 %v1109_v17 }
 0x2f3   :  { %v472_v48 = vpop.xlane.xlu1 %471 }
 0x2f4   :  { %v1347_v57 = vmul.f32 0.125, %v472_v48 }
 0x2f6   :  { %v504_v44 = vmul.f32 %v1347_v57, %v1347_v57 }
 0x2fb   :  { %v475_v4 = vpop.xlane.xlu2 %474 }
 0x2fc   :  { %v1341_v8 = vmul.f32 0.125, %v475_v4 }
 0x2fe   :  { %v505_v51 = vmul.f32 %v1341_v8, %v1341_v8 }
 0x303   :  { %v491_v53 = vpop.xlane.xlu2 %490  ;;  %v478_v50 = vpop.xlane.xlu1 %477 }
 0x304   :  { %v501_v52 = vmul.f32 0.125, %v491_v53  ;;  %v1345_v10 = vmul.f32 0.125, %v478_v50 }
 0x305   :  { %v494_v54 = vpop.xlane.xlu0 %493 }
 0x306   :  { %v509_v56 = vsub.f32 %v501_v52, %v505_v51  ;;  %v506_v60 = vmul.f32 %v1345_v10, %v1345_v10  ;;  %v502_v61 = vmul.f32 0.125, %v494_v54 }
 0x308   :  { %v513_v58 = vmax.f32 %v509_v56, 0.0  ;;  %v510_v0 = vsub.f32 %v502_v61, %v506_v60 }
 0x30a   :  { %v517_v63 = vadd.f32 1e-05, %v513_v58  ;;  %v514_v16 = vmax.f32 %v510_v0, 0.0 }
 0x30b   :  { %v488_v11 = vpop.xlane.xlu2 %487  ;;  %v469_v26 = vpop.xlane.xlu1 %468 }
 0x30c   :  { %998 = vrsqrt.f32 %v517_v63  ;;  %v500_v46 = vmul.f32 0.125, %v488_v11  ;;  %v1353_v35 = vmul.f32 0.125, %v469_v26  ;;  %v518_v19 = vadd.f32 1e-05, %v514_v16 }
 0x30d   :  { %v485_v27 = vpop.xlane.xlu0 %484  ;;  %vm545_vm13 = vweird.f32 %v517_v63 }
 0x30e   :  { %v508_v12 = vsub.f32 %v500_v46, %v504_v44  ;;  %v499_v32 = vmul.f32 0.125, %v485_v27  ;;  %v503_v25 = vmul.f32 %v1353_v35, %v1353_v35  ;;  %vm555_vm7 = vweird.f32 %v518_v19 }
 0x30f   :  { %v564_v44 = vsub.f32 %v1311_v9, %v1347_v57  ;;  %v566_v46 = vsub.f32 %v1321_v37, %v1345_v10  ;;  %v619_v10 = vld [vmem:[#allocation5 + $0x60] sm:$0xff] }
 0x310   :  { %v512_v15 = vmax.f32 %v508_v12, 0.0  ;;  %v507_v13 = vsub.f32 %v499_v32, %v503_v25 }
 0x312   :  { %v999_v20 = vpop.eup %998  ;;  %v516_v22 = vadd.f32 1e-05, %v512_v15  ;;  %v511_v14 = vmax.f32 %v507_v13, 0.0  ;;  %v563_v13 = vsub.f32 %v1309_v33, %v1353_v35  ;;  %v622_v33 = vld [vmem:[#allocation5 + $0x78] sm:$0xff] }
 0x313   :  { %v540_v23 = vmul.f32 %v999_v20, %v517_v63  ;;  %vm546_vm12 = vweird.f32 %v999_v20  ;;  %v604_v60 = vpop.permute.xlu2 %603 }
 0x314   :  { %1000 = vrsqrt.f32 %v516_v22  ;;  %v515_v24 = vadd.f32 1e-05, %v511_v14  ;;  %vm547_vm14 = vmor %vm545_vm13, %vm546_vm12  ;;  %vm535_vm4 = vweird.f32 %v516_v22 }
 0x315   :  { %v541_v49 = vmul.f32 %v999_v20, %v540_v23  ;;  %v621_v23 = vld [vmem:[#allocation5 + $0x70] sm:$0xff] }
 0x316   :  { %1002 = vrsqrt.f32 %v515_v24  ;;  %vm525_vm0 = vweird.f32 %v515_v24 }
 0x317   :  { %v542_v29 = vmul.f32 0.5, %v541_v49  ;;  %1004 = vrsqrt.f32 %v518_v19 }
 0x319   :  { %v543_v30 = vsub.f32 1.5, %v542_v29 }
 0x31a   :  { %v1001_v62 = vpop.eup %1000 }
 0x31b   :  { %v530_v28 = vmul.f32 %v1001_v62, %v516_v22  ;;  %v544_v6 = vmul.f32 %v999_v20, %v543_v30  ;;  %vm536_vm3 = vweird.f32 %v1001_v62  ;;  %v620_v22 = vld [vmem:[#allocation5 + $0x68] sm:$0xff] }
 0x31c   :  { %v1003_v31 = vpop.eup %1002  ;;  %vm537_vm5 = vmor %vm535_vm4, %vm536_vm3 }
 0x31d   :  { %v548_v59 = vsel %vm547_vm14, %v999_v20, %v544_v6  ;;  %v531_v55 = vmul.f32 %v1001_v62, %v530_v28  ;;  %v520_v21 = vmul.f32 %v1003_v31, %v515_v24  ;;  %v1005_v38 = vpop.eup %1004  ;;  %vm526_vm15 = vweird.f32 %v1003_v31 }
 0x31e   :  { %v561_v36 = vmul.f32 %v548_v59, %v1154_v5  ;;  %v550_v39 = vmul.f32 %v1005_v38, %v518_v19  ;;  %vm527_vm2 = vmor %vm525_vm0, %vm526_vm15  ;;  %vm556_vm6 = vweird.f32 %v1005_v38 }
 0x31f   :  { %v521_v18 = vmul.f32 %v1003_v31, %v520_v21  ;;  %v532_v40 = vmul.f32 0.5, %v531_v55  ;;  %vm557_vm8 = vmor %vm555_vm7, %vm556_vm6  ;;  %vm838_vm6 = vcmask 61440  }
 0x320   :  { %579 = vperm.xlu2 %970, %v561_v36   ;;  %v551_v42 = vmul.f32 %v1005_v38, %v550_v39  ;;  %v609_v27 = vpop.permute.xlu0 %608 }
 0x321   :  { %v522_v2 = vmul.f32 0.5, %v521_v18  ;;  %v533_v43 = vsub.f32 1.5, %v532_v40  ;;  %v1110_v18 = vmov 69  }
 0x322   :  { %v552_v17 = vmul.f32 0.5, %v551_v42  ;;  %973 = vset.pattern.permute.xlu0 %v1110_v18 }
 0x323   :  { %v523_v41 = vsub.f32 1.5, %v522_v2  ;;  %v534_v53 = vmul.f32 %v1001_v62, %v533_v43 }
 0x324   :  { %v553_v50 = vsub.f32 1.5, %v552_v17 }
 0x325   :  { %v524_v45 = vmul.f32 %v1003_v31, %v523_v41  ;;  %v538_v51 = vsel %vm537_vm5, %v1001_v62, %v534_v53  ;;  %v1111_v41 = vmov 68  }
 0x326   :  { %v560_v52 = vmul.f32 %v538_v51, %v1146_v3  ;;  %v554_v54 = vmul.f32 %v1005_v38, %v553_v50 }
 0x327   :  { %v528_v48 = vsel %vm527_vm2, %v1003_v31, %v524_v45 }
 0x328   :  { %971 = vset.pattern.permute.xlu2 %v1108_v47  ;;  %v559_v4 = vmul.f32 %v528_v48, %v1138_v1  ;;  %v558_v56 = vsel %vm557_vm8, %v1005_v38, %v554_v54 }
 0x329   :  { %598 = vperm.xlu2 %971, %v1146_v3   ;;  %v562_v58 = vmul.f32 %v558_v56, %v1162_v7  ;;  %v565_v3 = vsub.f32 %v1315_v34, %v1341_v8 }
 0x32a   :  { %569 = vperm.xlu1 %969, %v559_v4  }
 0x331   :  { %974 = vset.pattern.permute.xlu2 %v1110_v18 }
 0x332   :  { %574 = vperm.xlu1 %969, %v560_v52  }
 0x33a   :  { %584 = vperm.xlu1 %969, %v562_v58  }
 0x342   :  { %972 = vset.pattern.permute.xlu1 %v1108_v47 }
 0x343   :  { %593 = vperm.xlu1 %972, %v1138_v1  }
 0x34b   :  { %975 = vset.pattern.permute.xlu1 %v1111_v41 }
 0x37a   :  { %v580_v11 = vpop.permute.xlu2 %579 }
 0x37b   :  { %v589_v26 = vmul.f32 %v580_v11, %v565_v3 }
 0x37d   :  { %v613_v25 = vadd.f32 %v604_v60, %v589_v26 }
 0x37f   :  { %v617_v34 = vmax.f32 %v613_v25, 0.0 }
 0x383   :  { %v599_v32 = vpop.permute.xlu2 %598 }
 0x39c   :  { %v570_v61 = vpop.permute.xlu1 %569 }
 0x39d   :  { %v587_v8 = vmul.f32 %v570_v61, %v563_v13 }
 0x3a4   :  { %v575_v63 = vpop.permute.xlu1 %574 }
 0x3a5   :  { %v588_v12 = vmul.f32 %v575_v63, %v564_v44 }
 0x3a7   :  { %v612_v15 = vadd.f32 %v599_v32, %v588_v12 }
 0x3a9   :  { %v616_v20 = vmax.f32 %v612_v15, 0.0 }
 0x3ac   :  { %v585_v0 = vpop.permute.xlu1 %584 }
 0x3ad   :  { %v590_v47 = vmul.f32 %v585_v0, %v566_v46 }
 0x3af   :  { %v614_v1 = vadd.f32 %v609_v27, %v590_v47 }
 0x3b1   :  { %v618_v16 = vmax.f32 %v614_v1, 0.0 }
 0x3b3   :  { %648 = vmatpush.msra.mxu2 %v618_v16 }
 0x3b5   :  { %649 = vmatpush.msra.mxu2 %v617_v34  ;;  %v594_v9 = vpop.permute.xlu1 %593 }
 0x3b6   :  { %v611_v57 = vadd.f32 %v594_v9, %v587_v8 }
 0x3b7   :  { %650 = vmatpush.msra.mxu2 %v616_v20 }
 0x3b8   :  { %v615_v37 = vmax.f32 %v611_v57, 0.0 }
 0x3ba   :  { %651 = vmatpush.msra.mxu2 %v615_v37 }
 0x3bb   :  { %940 = vmatmul.msk.f32.vlgmr.msra.gmra.mxu2 %vm623_vm9, %v619_v10  ;;  %v1020_v10 = vld [vmem:[#allocation5 + $0x10] sm:$0xff] }
 0x3c3   :  { %941 = vmatmul.msk.f32.gmra.mxu2 %vm623_vm9, %v620_v22 }
 0x3cb   :  { %942 = vmatmul.msk.f32.gmra.mxu2 %vm623_vm9, %v621_v23 }
 0x3d3   :  { %943 = vmatmul.msk.f32.gmra.mxu2 %vm623_vm9, %v622_v33 }
 0x43e   :  { %v1377_v35 = vpop.f32.mrf.mxu2 }
 0x43f   :  { %v677_v59 = vmul.f32 %v1377_v35, %v1377_v35  ;;  %v665_v38 = vsel %vm120_vm1, %v1377_v35, 0.0 }
 0x441   :  { %v681_v21 = vsel %vm120_vm1, %v677_v59, 0.0 }
 0x446   :  { %v1379_v14 = vpop.f32.mrf.mxu2 }
 0x447   :  { %v668_v49 = vsel %vm120_vm1, %v1379_v14, 0.0  ;;  %v678_v55 = vmul.f32 %v1379_v14, %v1379_v14 }
 0x448   :  { %669 = vadd.xlane.f32.xlu2 %v668_v49 }
 0x449   :  { %v684_v36 = vsel %vm120_vm1, %v678_v55, 0.0 }
 0x44e   :  { %v1383_v19 = vpop.f32.mrf.mxu2 }
 0x44f   :  { %v671_v24 = vsel %vm120_vm1, %v1383_v19, 0.0  ;;  %v679_v29 = vmul.f32 %v1383_v19, %v1383_v19 }
 0x450   :  { %672 = vadd.xlane.f32.xlu0 %v671_v24 }
 0x451   :  { %v687_v28 = vsel %vm120_vm1, %v679_v29, 0.0 }
 0x456   :  { %v1389_v30 = vpop.f32.mrf.mxu2 }
 0x457   :  { %v680_v62 = vmul.f32 %v1389_v30, %v1389_v30  ;;  %v674_v6 = vsel %vm120_vm1, %v1389_v30, 0.0 }
 0x458   :  { %688 = vadd.xlane.f32.xlu0 %v687_v28  ;;  %675 = vadd.xlane.f32.xlu2 %v674_v6 }
 0x459   :  { %v690_v31 = vsel %vm120_vm1, %v680_v62, 0.0 }
 0x45a   :  { %691 = vadd.xlane.f32.xlu1 %v690_v31 }
 0x460   :  { %682 = vadd.xlane.f32.xlu0 %v681_v21  ;;  %685 = vadd.xlane.f32.xlu2 %v684_v36  ;;  %v1021_v36 = vld [vmem:[#allocation5 + $0x8] sm:$0xff] }
 0x462   :  { %666 = vadd.xlane.f32.xlu1 %v665_v38  ;;  %v1022_v38 = vld [vmem:[#allocation5] sm:$0xff] }
 0x474   :  { %802 = vperm.xlu0 %973, %v1162_v7  }
 0x478   :  { %798 = vperm.xlu2 %974, %v1154_v5  }
 0x480   :  { %976 = vset.pattern.permute.xlu2 %v1111_v41 }
 0x4bb   :  { %v670_v39 = vpop.xlane.xlu2 %669 }
 0x4bc   :  { %v1415_v50 = vmul.f32 0.125, %v670_v39 }
 0x4be   :  { %v702_v56 = vmul.f32 %v1415_v50, %v1415_v50 }
 0x4c3   :  { %v673_v40 = vpop.xlane.xlu0 %672 }
 0x4c4   :  { %v1409_v2 = vmul.f32 0.125, %v673_v40 }
 0x4c6   :  { %v703_v45 = vmul.f32 %v1409_v2, %v1409_v2 }
 0x4cb   :  { %v689_v42 = vpop.xlane.xlu0 %688  ;;  %v676_v43 = vpop.xlane.xlu2 %675 }
 0x4cc   :  { %v699_v48 = vmul.f32 0.125, %v689_v42  ;;  %v1413_v53 = vmul.f32 0.125, %v676_v43 }
 0x4cd   :  { %v692_v4 = vpop.xlane.xlu1 %691 }
 0x4ce   :  { %v707_v17 = vsub.f32 %v699_v48, %v703_v45  ;;  %v704_v51 = vmul.f32 %v1413_v53, %v1413_v53  ;;  %v700_v52 = vmul.f32 0.125, %v692_v4 }
 0x4d0   :  { %v711_v5 = vmax.f32 %v707_v17, 0.0  ;;  %v708_v63 = vsub.f32 %v700_v52, %v704_v51  ;;  %v1023_v17 = vld [vmem:[#allocation5 + $0x18] sm:$0xff] }
 0x4d2   :  { %v715_v7 = vadd.f32 1e-05, %v711_v5  ;;  %v712_v27 = vmax.f32 %v708_v63, 0.0 }
 0x4d3   :  { %v686_v54 = vpop.xlane.xlu2 %685  ;;  %v683_v58 = vpop.xlane.xlu0 %682 }
 0x4d4   :  { %1006 = vrsqrt.f32 %v715_v7  ;;  %v698_v60 = vmul.f32 0.125, %v686_v54  ;;  %v697_v26 = vmul.f32 0.125, %v683_v58  ;;  %v716_v15 = vadd.f32 1e-05, %v712_v27 }
 0x4d5   :  { %v667_v61 = vpop.xlane.xlu1 %666  ;;  %vm743_vm10 = vweird.f32 %v715_v7 }
 0x4d6   :  { %v1421_v11 = vmul.f32 0.125, %v667_v61  ;;  %v706_v3 = vsub.f32 %v698_v60, %v702_v56  ;;  %vm753_vm4 = vweird.f32 %v716_v15  ;;  %v763_v56 = vsub.f32 %v1383_v19, %v1409_v2 }
 0x4d7   :  { %v762_v60 = vsub.f32 %v1379_v14, %v1415_v50  ;;  %v764_v61 = vsub.f32 %v1389_v30, %v1413_v53  ;;  %v813_v53 = vld [vmem:[#allocation5 + $0x80] sm:$0x1f] }
 0x4d8   :  { %v701_v44 = vmul.f32 %v1421_v11, %v1421_v11  ;;  %v710_v46 = vmax.f32 %v706_v3, 0.0 }
 0x4da   :  { %v1007_v0 = vpop.eup %1006  ;;  %v705_v12 = vsub.f32 %v697_v26, %v701_v44  ;;  %v714_v32 = vadd.f32 1e-05, %v710_v46 }
 0x4db   :  { %v738_v47 = vmul.f32 %v1007_v0, %v715_v7  ;;  %vm744_vm1 = vweird.f32 %v1007_v0  ;;  %v799_v7 = vpop.permute.xlu2 %798 }
 0x4dc   :  { %v709_v1 = vmax.f32 %v705_v12, 0.0  ;;  %1008 = vrsqrt.f32 %v714_v32  ;;  %vm745_vm11 = vmor %vm743_vm10, %vm744_vm1  ;;  %vm733_vm0 = vweird.f32 %v714_v32 }
 0x4dd   :  { %v739_v25 = vmul.f32 %v1007_v0, %v738_v47  ;;  %v761_v47 = vsub.f32 %v1377_v35, %v1421_v11  ;;  %v1112_v11 = vmov 70  }
 0x4de   :  { %v713_v16 = vadd.f32 1e-05, %v709_v1 }
 0x4df   :  { %v740_v13 = vmul.f32 0.5, %v739_v25 }
 0x4e0   :  { %1010 = vrsqrt.f32 %v713_v16  ;;  %vm723_vm13 = vweird.f32 %v713_v16 }
 0x4e1   :  { %v741_v34 = vsub.f32 1.5, %v740_v13  ;;  %1012 = vrsqrt.f32 %v716_v15  ;;  %v1113_v13 = vmov 71  }
 0x4e2   :  { %v1009_v8 = vpop.eup %1008  ;;  %981 = vset.pattern.permute.xlu0 %v1113_v13 }
 0x4e3   :  { %v742_v20 = vmul.f32 %v1007_v0, %v741_v34  ;;  %v728_v9 = vmul.f32 %v1009_v8, %v714_v32  ;;  %vm734_vm15 = vweird.f32 %v1009_v8 }
 0x4e4   :  { %vm735_vm2 = vmor %vm733_vm0, %vm734_vm15 }
 0x4e5   :  { %v746_v57 = vsel %vm745_vm11, %v1007_v0, %v742_v20  ;;  %v729_v23 = vmul.f32 %v1009_v8, %v728_v9 }
 0x4e6   :  { %v1011_v37 = vpop.eup %1010  ;;  %v759_v22 = vmul.f32 %v1020_v10, %v746_v57  ;;  %v803_v3 = vpop.permute.xlu0 %802 }
 0x4e7   :  { %v718_v33 = vmul.f32 %v1011_v37, %v713_v16  ;;  %v1013_v49 = vpop.eup %1012  ;;  %v730_v62 = vmul.f32 0.5, %v729_v23  ;;  %vm724_vm12 = vweird.f32 %v1011_v37 }
 0x4e8   :  { %777 = vperm.xlu2 %976, %v759_v22   ;;  %v748_v29 = vmul.f32 %v1013_v49, %v716_v15  ;;  %vm725_vm14 = vmor %vm723_vm13, %vm724_vm12  ;;  %vm754_vm3 = vweird.f32 %v1013_v49 }
 0x4e9   :  { %v719_v24 = vmul.f32 %v1011_v37, %v718_v33  ;;  %v731_v59 = vsub.f32 1.5, %v730_v62  ;;  %vm755_vm5 = vmor %vm753_vm4, %vm754_vm3 }
 0x4ea   :  { %v749_v31 = vmul.f32 %v1013_v49, %v748_v29  ;;  %v837_v29 = vld [vmem:[#allocation5] sm:$0x1f] }
 0x4eb   :  { %v720_v28 = vmul.f32 0.5, %v719_v24  ;;  %v732_v41 = vmul.f32 %v1009_v8, %v731_v59 }
 0x4ec   :  { %v750_v40 = vmul.f32 0.5, %v749_v31 }
 0x4ed   :  { %v721_v6 = vsub.f32 1.5, %v720_v28  ;;  %v736_v43 = vsel %vm735_vm2, %v1009_v8, %v732_v41 }
 0x4ee   :  { %v751_v42 = vsub.f32 1.5, %v750_v40  ;;  %v758_v45 = vmul.f32 %v1021_v36, %v736_v43 }
 0x4ef   :  { %v722_v55 = vmul.f32 %v1011_v37, %v721_v6 }
 0x4f0   :  { %977 = vset.pattern.permute.xlu2 %v1110_v18  ;;  %v752_v48 = vmul.f32 %v1013_v49, %v751_v42 }
 0x4f1   :  { %v726_v21 = vsel %vm725_vm14, %v1011_v37, %v722_v55  ;;  %794 = vperm.xlu2 %977, %v1021_v36  }
 0x4f2   :  { %v757_v39 = vmul.f32 %v1022_v38, %v726_v21  ;;  %v756_v4 = vsel %vm755_vm5, %v1013_v49, %v752_v48 }
 0x4f3   :  { %v760_v5 = vmul.f32 %v1023_v17, %v756_v4 }
 0x4f4   :  { %767 = vperm.xlu1 %975, %v757_v39  }
 0x4fc   :  { %772 = vperm.xlu1 %975, %v758_v45  }
 0x504   :  { %782 = vperm.xlu1 %975, %v760_v5  }
 0x50c   :  { %978 = vset.pattern.permute.xlu1 %v1110_v18 }
 0x50d   :  { %790 = vperm.xlu1 %978, %v1022_v38  }
 0x515   :  { %979 = vset.pattern.permute.xlu1 %v1112_v11 }
 0x542   :  { %v778_v54 = vpop.permute.xlu2 %777 }
 0x543   :  { %v787_v58 = vmul.f32 %v778_v54, %v763_v56 }
 0x545   :  { %v807_v0 = vadd.f32 %v799_v7, %v787_v58 }
 0x547   :  { %v811_v19 = vmax.f32 %v807_v0, 0.0 }
 0x54b   :  { %v795_v18 = vpop.permute.xlu2 %794 }
 0x566   :  { %v768_v51 = vpop.permute.xlu1 %767 }
 0x567   :  { %v785_v2 = vmul.f32 %v768_v51, %v761_v47 }
 0x56e   :  { %v773_v52 = vpop.permute.xlu1 %772 }
 0x56f   :  { %v786_v26 = vmul.f32 %v773_v52, %v762_v60 }
 0x571   :  { %v806_v27 = vadd.f32 %v795_v18, %v786_v26 }
 0x573   :  { %v810_v32 = vmax.f32 %v806_v27, 0.0 }
 0x576   :  { %v783_v63 = vpop.permute.xlu1 %782 }
 0x577   :  { %v788_v44 = vmul.f32 %v783_v63, %v764_v61 }
 0x579   :  { %v808_v46 = vadd.f32 %v803_v3, %v788_v44 }
 0x57b   :  { %v812_v12 = vmax.f32 %v808_v46, 0.0 }
 0x57d   :  { %829 = vmatpush.msrb.mxu3 %v812_v12 }
 0x57f   :  { %v791_v14 = vpop.permute.xlu1 %790  ;;  %830 = vmatpush.msrb.mxu3 %v811_v19 }
 0x580   :  { %v805_v50 = vadd.f32 %v791_v14, %v785_v2 }
 0x581   :  { %831 = vmatpush.msrb.mxu3 %v810_v32 }
 0x582   :  { %v809_v30 = vmax.f32 %v805_v50, 0.0 }
 0x584   :  { %832 = vmatpush.msrb.mxu3 %v809_v30 }
 0x585   :  { %944 = vmatmul.msk.f32.vlgmr.msrb.gmra.mxu3 %vm623_vm9, %v813_v53 }
 0x608   :  { %v834_v1 = vpop.f32.mrf.mxu3 }
 0x609   :  { %v842_v25 = vmul.f32 %v834_v1, %v834_v1  ;;  %v839_v15 = vsel %vm838_vm6, %v834_v1, 0.0 }
 0x60a   :  { %840 = vadd.xlane.f32.xlu2 %v839_v15 }
 0x60b   :  { %v843_v35 = vsel %vm838_vm6, %v842_v25, 0.0 }
 0x60c   :  { %844 = vadd.xlane.f32.xlu0 %v843_v35 }
 0x67d   :  { %v841_v16 = vpop.xlane.xlu2 %840 }
 0x67e   :  { %v846_v34 = vmul.f32 0.125, %v841_v16 }
 0x67f   :  { %v845_v8 = vpop.xlane.xlu0 %844 }
 0x680   :  { %v848_v20 = vmul.f32 %v846_v34, %v846_v34  ;;  %v847_v9 = vmul.f32 0.125, %v845_v8  ;;  %v863_v59 = vsub.f32 %v834_v1, %v846_v34 }
 0x682   :  { %v849_v57 = vsub.f32 %v847_v9, %v848_v20 }
 0x684   :  { %v850_v37 = vmax.f32 %v849_v57, 0.0 }
 0x686   :  { %v851_v10 = vadd.f32 1e-05, %v850_v37 }
 0x688   :  { %1014 = vrsqrt.f32 %v851_v10  ;;  %vm858_vm8 = vweird.f32 %v851_v10 }
 0x68e   :  { %v1015_v22 = vpop.eup %1014 }
 0x68f   :  { %v853_v23 = vmul.f32 %v1015_v22, %v851_v10  ;;  %vm859_vm7 = vweird.f32 %v1015_v22 }
 0x690   :  { %vm860_vm9 = vmor %vm858_vm8, %vm859_vm7 }
 0x691   :  { %v854_v33 = vmul.f32 %v1015_v22, %v853_v23 }
 0x693   :  { %v855_v49 = vmul.f32 0.5, %v854_v33 }
 0x695   :  { %v856_v24 = vsub.f32 1.5, %v855_v49 }
 0x697   :  { %v857_v62 = vmul.f32 %v1015_v22, %v856_v24 }
 0x699   :  { %v861_v28 = vsel %vm860_vm9, %v1015_v22, %v857_v62 }
 0x69a   :  { %v862_v6 = vmul.f32 %v861_v28, %v837_v29 }
 0x69c   :  { %866 = vperm.xlu1 %979, %v862_v6  }
 0x6a4   :  { %980 = vset.pattern.permute.xlu1 %v1113_v13 }
 0x6a5   :  { %872 = vperm.xlu1 %980, %v837_v29  }
 0x70e   :  { %v867_v31 = vpop.permute.xlu1 %866 }
 0x70f   :  { %v869_v55 = vmul.f32 %v867_v31, %v863_v59 }
 0x717   :  { %v873_v21 = vpop.permute.xlu1 %872 }
 0x718   :  { %v875_v36 = vadd.f32 %v873_v21, %v869_v55 }
 0x71a   :  { %v876_v38 = vsel %vm838_vm6, %v875_v36, -inf }
 0x71b   :  { %v877_v39 = vrot.slane %v876_v38, 4 }
 0x71d   :  { %v878_v40 = vmax.f32 %v876_v38, %v877_v39 }
 0x71f   :  { %v879_v41 = vrot.slane %v878_v40, 2 }
 0x721   :  { %v880_v42 = vmax.f32 %v878_v40, %v879_v41 }
 0x723   :  { %v881_v43 = vrot.slane %v880_v42, 1 }
 0x725   :  { %v882_v45 = vmax.f32 %v880_v42, %v881_v43 }
 0x727   :  { %v883_v48 = vsub.f32 %v875_v36, %v882_v45 }
 0x729   :  { %v884_v4 = vmul.f32 1.442695, %v883_v48 }
 0x72b   :  { %1016 = vpow2.f32 %v884_v4 }
 0x731   :  { %v1017_v17 = vpop.eup %1016 }
 0x732   :  { %v886_v5 = vsel %vm838_vm6, %v1017_v17, 0.0 }
 0x733   :  { %v887_v7 = vrot.slane %v886_v5, 4 }
 0x735   :  { %v888_v51 = vadd.f32 %v887_v7, %v886_v5 }
 0x737   :  { %v889_v52 = vrot.slane %v888_v51, 2 }
 0x739   :  { %v890_v54 = vadd.f32 %v889_v52, %v888_v51 }
 0x73b   :  { %v891_v56 = vrot.slane %v890_v54, 1 }
 0x73d   :  { %v892_v58 = vadd.f32 %v891_v56, %v890_v54 }
 0x73f   :  { %1018 = vrcp.f32 %v892_v58  ;;  %v904_v3 = vand.u32 2147483648, %v892_v58  ;;  %v902_v44 = vand.u32 2147483647, %v892_v58  ;;  %vm898_vm10 = vweird.f32 %v892_v58 }
 0x741   :  { %v905_v46 = vor.u32 1.1754944e-38, %v904_v3  ;;  %vm903_vm12 = vcmp.eq.f32.partialorder %v902_v44, 8.507059e+37 }
 0x745   :  { %v1019_v60 = vpop.eup %1018 }
 0x746   :  { %v894_v61 = vmul.f32 %v1019_v60, %v892_v58  ;;  %vm899_vm1 = vweird.f32 %v1019_v60 }
 0x747   :  { %vm900_vm11 = vmor %vm898_vm10, %vm899_vm1 }
 0x748   :  { %v895_v63 = vsub.f32 1.0, %v894_v61 }
 0x74a   :  { %v896_v26 = vmul.f32 %v1019_v60, %v895_v63 }
 0x74c   :  { %v897_v18 = vadd.f32 %v1019_v60, %v896_v26 }
 0x74e   :  { %v901_v0 = vsel %vm900_vm11, %v1019_v60, %v897_v18 }
 0x74f   :  { %v906_v27 = vsel %vm903_vm12, %v905_v46, %v901_v0 }
 0x750   :  { %v907_v12 = vmul.f32 %v1017_v17, %v906_v27 }
 0x752   :  { %908 = vst.msk [vmem:[#allocation7] sm:$0x1f] %vm838_vm6, %v907_v12 }
 0x753   :  { %919 = dma.vmem_to_hbm [thread:$0]  %s915_s1, 128, %s917_s23, [#allocation4]  }
 0x754   :  { %1100 = dma.done.wait [#allocation4], 128  }
 0x755   :  { %1101 = vsyncadd [#allocation4], 4294967168 }
 0x756   :  { %924 = vsyncpa [#allocation3], 1 }
 0x757   :  { %925 = vsyncpa [#allocation6], 1 }
 0x758   :  { %926 = vsyncpa [#allocation4], 1 }

</bundles_post_ra>
